<compile_context>
chip_gen: v5e
topology: v5e:2x2
jax: 0.10.0
libtpu: 0.0.40
codegen_flags: <defaults>
</compile_context>

<pallas_src>
import functools

import jax
import jax.numpy as jnp
from jax import lax
from jax.experimental import pallas as pl
from jax.experimental.pallas import tpu as pltpu

_LANES = 128


def _dispreg_kernel(x_ref, o_ref, acc_ref, *, D):
    # x_ref:   (1, tD, tR, 128)  one disparity chunk of one spatial tile
    # o_ref:   (1, tR, 128)      same block index for every d step (resident)
    # acc_ref: (tR, 128) f32     accumulator scratch, persists across d steps
    d_blk = pl.program_id(2)
    tD = x_ref.shape[1]

    @pl.when(d_blk == 0)
    def _init():
        acc_ref[...] = jnp.zeros_like(acc_ref)

    # Disparity index for this chunk, shape (tD, 1, 128).
    d_idx = d_blk * tD + lax.broadcasted_iota(jnp.int32, (tD, 1, _LANES), 0)
    w = d_idx.astype(jnp.float32)

    x = x_ref[0].astype(jnp.float32)            # (tD, tR, 128)
    if D % tD != 0:
        # The last d chunk runs past D: zero the (unspecified) padded tail.
        x = jnp.where(d_idx < D, x, 0.0)

    # Single vectorized weighted reduction over the disparity chunk.
    acc_ref[...] += jnp.sum(x * w, axis=0)

    @pl.when(d_blk == pl.num_programs(2) - 1)
    def _finalize():
        o_ref[...] = acc_ref[...].astype(o_ref.dtype)[None]


def _vmem_budgets():
    """(working-set budget, vmem_limit_bytes), chosen per TPU generation."""
    cap = None
    try:
        cap = int(getattr(pltpu.get_tpu_info(), "vmem_capacity_bytes", 0)) or None
    except Exception:
        cap = None
    if cap is None:
        cap = 64 * 1024 * 1024              # conservative (v7x-sized) default
    if cap >= 100 * 1024 * 1024:            # v5e / v6e: 128 MiB VMEM
        return 88 * 1024 * 1024, 112 * 1024 * 1024
    return 26 * 1024 * 1024, 56 * 1024 * 1024   # v7x: 64 MiB per TensorCore


def _choose_tiles(N, D, R, in_itemsize, out_itemsize, budget, sub_mult):
    """Pick (tD, tR) so the double-buffered working set fits `budget`."""

    def r_cap(td):
        per_row = (2 * td * _LANES * in_itemsize   # double-buffered input block
                   + 2 * td * _LANES * 4           # headroom for in-step f32 temps
                   + 2 * _LANES * out_itemsize     # double-buffered output block
                   + _LANES * 4)                   # f32 accumulator
        return budget // per_row

    # Prefer the whole disparity range per step; shrink only if a single
    # sublane-aligned row group would not fit the budget.
    tD = D
    while tD > 1 and r_cap(tD) < min(R, sub_mult):
        tD = pl.cdiv(tD, 2)

    cap = max(1, r_cap(tD))
    if R <= cap:
        tR = R                                  # full extent: always legal
    else:
        tR = max(sub_mult, (cap // sub_mult) * sub_mult)

    # Guarantee >= 2 "parallel" grid steps so both v7x TensorCores get work.
    if N * pl.cdiv(R, tR) < 2 and R > sub_mult:
        tR = max(sub_mult, (pl.cdiv(R, 2) // sub_mult) * sub_mult)

    return tD, tR


def disparity_regression(x, *, out_dtype=jnp.float32):
    """x: (N, maxdisp, H, W) -> (N, H, W) = sum_d d * x[:, d]."""
    N, D, H, W = x.shape
    S = H * W
    in_itemsize = jnp.dtype(x.dtype).itemsize
    out_itemsize = jnp.dtype(out_dtype).itemsize

    # Lane-dense layout: flatten the spatial dims and view them as (R, 128).
    s_pad = pl.cdiv(S, _LANES) * _LANES
    x3 = x.reshape(N, D, S)
    if s_pad != S:
        # TODO(synk): only hit when H*W is not a multiple of 128; costs one
        # extra HBM pass for the pad (zeros contribute 0 to the weighted sum).
        x3 = jnp.pad(x3, ((0, 0), (0, 0), (0, s_pad - S)))
    R = s_pad // _LANES
    x4 = x3.reshape(N, D, R, _LANES)

    budget, vmem_limit = _vmem_budgets()
    # Sublane packing multiple: 8 for f32, 16 for bf16, 32 for int8/fp8.
    sub_mult = max(8 * max(1, 4 // in_itemsize), 8 * max(1, 4 // out_itemsize))
    tD, tR = _choose_tiles(N, D, R, in_itemsize, out_itemsize, budget, sub_mult)

    grid = (N, pl.cdiv(R, tR), pl.cdiv(D, tD))   # reduction axis last

    cost = pl.CostEstimate(
        flops=2 * N * D * s_pad,
        transcendentals=0,
        bytes_accessed=N * D * s_pad * in_itemsize + N * s_pad * out_itemsize,
    )

    out = pl.pallas_call(
        functools.partial(_dispreg_kernel, D=D),
        out_shape=jax.ShapeDtypeStruct((N, R, _LANES), out_dtype),
        grid_spec=pltpu.PrefetchScalarGridSpec(
            num_scalar_prefetch=0,
            grid=grid,
            in_specs=[pl.BlockSpec((1, tD, tR, _LANES),
                                   lambda n, r, d: (n, d, r, 0))],
            out_specs=pl.BlockSpec((1, tR, _LANES),
                                   lambda n, r, d: (n, r, 0)),
            scratch_shapes=[pltpu.VMEM((tR, _LANES), jnp.float32)],
        ),
        compiler_params=pltpu.CompilerParams(
            dimension_semantics=("parallel", "parallel", "arbitrary"),
            vmem_limit_bytes=vmem_limit,
        ),
        cost_estimate=cost,
    )(x4)

    return out.reshape(N, s_pad)[:, :S].reshape(N, H, W)


if __name__ == "__main__":
    key = jax.random.PRNGKey(0)
    N, maxdisp, H, W = 2, 16, 16, 16
    # x is typically a softmax over the disparity dim; use one here so values
    # are realistic, though the kernel handles any input.
    logits = jax.random.normal(key, (N, maxdisp, H, W), dtype=jnp.float32)
    x = jax.nn.softmax(logits, axis=1)

    out = disparity_regression(x)
    out = jax.block_until_ready(out)

    # reference check in plain JAX
    disp = jnp.arange(maxdisp, dtype=jnp.float32).reshape(1, maxdisp, 1, 1)
    ref = jnp.sum(x * disp, axis=1)
    assert out.shape == (N, H, W)
    assert jnp.allclose(out, ref, atol=1e-5, rtol=1e-5)

    print("KERNEL_OK")
</pallas_src>

<mosaic_0001>
module attributes {stable_mosaic.version = 11 : i64} {
  func.func @_dispreg_kernel(%arg0: i32, %arg1: i32, %arg2: i32, %arg3: memref<1x16x2x128xf32, #tpu.memory_space<vmem>>, %arg4: memref<1x2x128xf32, #tpu.memory_space<vmem>>, %arg5: memref<2x128xf32, #tpu.memory_space<vmem>>) attributes {dimension_semantics = [#tpu.dimension_semantics<parallel>, #tpu.dimension_semantics<parallel>, #tpu.dimension_semantics<arbitrary>], iteration_bounds = array<i64: 2, 1, 1>, scalar_prefetch = 0 : i64, scratch_operands = 1 : i64, tpu.core_type = #tpu.core_type<tc>, window_params = [{transform_indices = @transform_0, window_bounds = array<i64: 1, 16, 2, 128>}, {transform_indices = @transform_1, window_bounds = array<i64: 1, 2, 128>}]} {
    %c0_i32 = arith.constant 0 : i32
    %0 = arith.cmpi eq, %arg2, %c0_i32 : i32
    %1 = arith.extui %0 : i1 to i32
    %c0_i32_0 = arith.constant 0 : i32
    %2 = arith.cmpi ne, %1, %c0_i32_0 : i32
    scf.if %2 {
      %cst_10 = arith.constant 0.000000e+00 : f32
      %19 = vector.broadcast %cst_10 : f32 to vector<2x128xf32>
      %c0_11 = arith.constant 0 : index
      %c0_12 = arith.constant 0 : index
      %20 = vector.load %arg5[%c0_11, %c0_12] : memref<2x128xf32, #tpu.memory_space<vmem>>, vector<2x128xf32>
      tpu.vector_store %arg5[%c0_11, %c0_12], %19 {strides = array<i32>} : memref<2x128xf32, #tpu.memory_space<vmem>>, vector<2x128xf32>,
    } else {
    }
    %c16_i32 = arith.constant 16 : i32
    %3 = arith.muli %arg2, %c16_i32 : i32
    %4 = tpu.iota {dimensions = array<i32: 0>} : vector<16x1x128xi32>
    %5 = vector.broadcast %3 : i32 to vector<16x1x128xi32>
    %6 = arith.addi %5, %4 : vector<16x1x128xi32>
    %7 = arith.sitofp %6 : vector<16x1x128xi32> to vector<16x1x128xf32>
    %c0 = arith.constant 0 : index
    %c0_1 = arith.constant 0 : index
    %c0_2 = arith.constant 0 : index
    %c0_3 = arith.constant 0 : index
    %8 = vector.load %arg3[%c0, %c0_1, %c0_2, %c0_3] : memref<1x16x2x128xf32, #tpu.memory_space<vmem>>, vector<1x16x2x128xf32>
    %9 = vector.shape_cast %8 : vector<1x16x2x128xf32> to vector<16x2x128xf32>
    %c0_4 = arith.constant 0 : index
    %c0_5 = arith.constant 0 : index
    %10 = vector.load %arg5[%c0_4, %c0_5] : memref<2x128xf32, #tpu.memory_space<vmem>>, vector<2x128xf32>
    %11 = vector.broadcast %7 : vector<16x1x128xf32> to vector<16x2x128xf32>
    %12 = arith.mulf %9, %11 : vector<16x2x128xf32>
    %cst = arith.constant dense<0.000000e+00> : vector<2x128xf32>
    %13 = vector.multi_reduction <add>, %12, %cst [0] : vector<16x2x128xf32> to vector<2x128xf32>
    %14 = arith.addf %10, %13 : vector<2x128xf32>
    %c0_6 = arith.constant 0 : index
    %c0_7 = arith.constant 0 : index
    %15 = vector.load %arg5[%c0_6, %c0_7] : memref<2x128xf32, #tpu.memory_space<vmem>>, vector<2x128xf32>
    tpu.vector_store %arg5[%c0_6, %c0_7], %14 {strides = array<i32>} : memref<2x128xf32, #tpu.memory_space<vmem>>, vector<2x128xf32>,
    %c0_i32_8 = arith.constant 0 : i32
    %16 = arith.cmpi eq, %arg2, %c0_i32_8 : i32
    %17 = arith.extui %16 : i1 to i32
    %c0_i32_9 = arith.constant 0 : i32
    %18 = arith.cmpi ne, %17, %c0_i32_9 : i32
    scf.if %18 {
      %c0_10 = arith.constant 0 : index
      %c0_11 = arith.constant 0 : index
      %19 = vector.load %arg5[%c0_10, %c0_11] : memref<2x128xf32, #tpu.memory_space<vmem>>, vector<2x128xf32>
      %20 = vector.shape_cast %19 : vector<2x128xf32> to vector<1x2x128xf32>
      %c0_12 = arith.constant 0 : index
      %c0_13 = arith.constant 0 : index
      %c0_14 = arith.constant 0 : index
      %21 = vector.load %arg4[%c0_12, %c0_13, %c0_14] : memref<1x2x128xf32, #tpu.memory_space<vmem>>, vector<1x2x128xf32>
      tpu.vector_store %arg4[%c0_12, %c0_13, %c0_14], %20 {strides = array<i32>} : memref<1x2x128xf32, #tpu.memory_space<vmem>>, vector<1x2x128xf32>,
    } else {
    }
    return
  }
  func.func @transform_0(%arg0: i32, %arg1: i32, %arg2: i32) -> (i32, i32, i32, i32) {
    %c0_i32 = arith.constant 0 : i32
    %c0_i32_0 = arith.constant 0 : i32
    return %arg0, %arg2, %arg1, %c0_i32 : i32, i32, i32, i32
  }
  func.func @transform_1(%arg0: i32, %arg1: i32, %arg2: i32) -> (i32, i32, i32) {
    %c0_i32 = arith.constant 0 : i32
    %c0_i32_0 = arith.constant 0 : i32
    return %arg0, %arg1, %c0_i32 : i32, i32, i32
  }
}

</mosaic_0001>

<bundles_post_ra>
// kernel: tpu_custom_call.1
= control target key start
LH: loop header
LB: loop body
LE: loop exit
PB: predicated region body
PF: predicated region fallthrough
CT: control target
= control target key end

     0   :  { %6 = vsyncpa [#allocation4], 0  ;;  %s741_s0 = inlined_call_operand.hbm [shape: f32[2,16,2,128], index: 0, kind: input, shape index: {}]   ;;  %s742_s1 = inlined_call_operand.hbm [shape: f32[2,2,128], index: 1, kind: output, shape index: {}]  }
   0x1   :  { %8 = vsyncpa [#allocation4 + $0x1], 0 }
   0x2   :  { %9 = vsyncpa [#allocation5], 0 }
   0x3   :  { %11 = vsyncpa [#allocation5 + $0x1], 0  ;;  %s586_s6 = smov 0   ;;  %s588_s7 = smov 0  }
   0x4   :  { %s590_s8 = smov 0   ;;  %s592_s9 = smov 0  }
   0x5   :  { %s594_s10 = smov 0   ;;  %s596_s11 = smov 0  }
   0x6 LB: > { %s379_s12 = sadd.s32 4294967295, %s571_s11   ;;  %s380_s13 = sadd.s32 4294967294, %s571_s11   ;;  %s571_s11 = sphi %s596_s11, %s17_s11   ;;  %s567_s10 = sphi %s594_s10, %s751_s10   ;;  %s563_s9 = sphi %s592_s9, %s750_s9   ;;  %s559_s8 = sphi %s590_s8, %s749_s8   ;;  %s555_s7 = sphi %s588_s7, %s748_s7   ;;  %s551_s6 = sphi %s586_s6, %s747_s6  }
   0x7   : > { %s36_s14 = sadd.s32 1, %s567_s10  ;;  %s47_s15 = sadd.s32 1, %s559_s8 }
   0x8   : > { %p38_p0 = scmp.ge.s32.totalorder %s36_s14, 2  ;;  %p54_p1 = scmp.ne.s32.totalorder %s559_s8, %s555_s7 }
   0x9   : > { %p55_p2 = scmp.eq.s32.totalorder %s571_s11, 0  ;;  %p60_p3 = scmp.ne.s32.totalorder %s555_s7, %s551_s6 }
   0xa   : > { %s753_s14 = smov (%p38_p0, %s36_s14), 0  ;;  %p61_p5 = scmp.eq.s32.totalorder %s379_s12, 0 }
   0xb   : > { %p627_p4 = por %p55_p2, %p54_p1  ;;  %s40_s17 = ssub.s32 %s567_s10, %s753_s14 }
   0xc   : > { %p86_p6 = scmp.eq.s32.totalorder %s379_s12, 1  ;;  %p45_p7 = scmp.eq.s32.totalorder %s40_s17, 0 }
   0xd   : > { %p633_p8 = por %p61_p5, %p60_p3  ;;  %p92_p10 = scmp.eq.s32.totalorder %s380_s13, 1 }
   0xe   : > { %p637_p9 = por %p86_p6, %p54_p1  ;;  %p382_p12 = scmp.ge.s32.totalorder %s571_s11, 2 }
   0xf   : > { %s642_s20 = scalar_select %p45_p7, %s559_s8, %s47_s15  }
  0x10   : > { %p644_p11 = por %p92_p10, %p60_p3  ;;  %p406_p13 = scmp.lt.s32.totalorder %s571_s11, 2 }
  0x11   : > { %s112_s22 = sand.u32 1, %s559_s8   ;;  %s393_s24 = sshll.u32 %s567_s10, 5 }
  0x12   : > { %s383_s23 = sshll.u32 %s112_s22, 5  ;;  %s124_s27 = scalar_lea.hbm %s741_s0, %s393_s24 }
  0x13   : > { %s116_s28 = scalar_lea.vmem [#allocation3], %s383_s23  ;;  %s125_s30 = sshll.u32 %s124_s27, 4  ;;  %s126_s30 = int_to_ptr.hbm [resolvable:$true] %s125_s30 }
  0x14   : > { %s127_s29 = sshll.u32 %s116_s28, 4  ;;  %p399_p0 = pnand %p406_p13, %p627_p4  ;;  %s128_s29 = int_to_ptr.vmem [resolvable:$true] %s127_s29 }
  0x15   : > { %p386_p1 = scmp.ge.s32.totalorder %s571_s11, 1  ;;  %s113_s2 = scalar_lea.sflag [#allocation4], %s112_s22 }
  0x16   : > { %s573_s3 = smov 32   ;;  %s574_s4 = smov 2  }
  0x17   : > { %401 = dma.hbm_to_vmem [thread:$0]  (!%p399_p0), %s126_s30, 512, %s128_s29, %s113_s2, %s573_s3, %s573_s3, %s574_s4  }
  0x18   : > { %p135_p2 = scmp.lt.s32.totalorder %s571_s11, 3 }
  0x1a   : > { %p136_p3 = pnand %p386_p1, %p135_p2 }
  0x1b   : > { %s660_s5 = sand.u32 (!%p136_p3), 1, %s555_s7  }
  0x1c   : > { %139 = sbr.rel (%p136_p3) target bundleno = 81 (0x51), region = 24  ;;  %s387_s12 = sshll.u32 (!%p136_p3), %s660_s5, 5 }
  0x1d   : > { %s142_s13 = scalar_lea.sflag (!%p136_p3), [#allocation4], %s660_s5  ;;  %s664_s15 = scalar_lea.vmem (!%p136_p3), [#allocation3], %s387_s12 }
  0x21   : > { %542 = dma.done.wait (%p633_p8), %s142_s13, 512  }
  0x22   : > { %544 = vsyncadd (%p633_p8), %s142_s13, 4294966784  ;;  %v575_v0 = vmov 0.0   ;;  %v204_v1 = vld [vmem:[%s664_s15] sm:$0x3]  ;;  %v206_v2 = vld [vmem:[%s664_s15 + $0x4] sm:$0x3] }
  0x23   : > { %170 = vst [vmem:[#allocation2] sm:$0x3] %v575_v0  ;;  %v207_v3 = vld [vmem:[%s664_s15 + $0x6] sm:$0x3]  ;;  %v221_v4 = vmul.f32 0.0, %v204_v1  ;;  %v223_v5 = vmul.f32 2.0, %v206_v2 }
  0x24   : > { %v205_v6 = vld [vmem:[%s664_s15 + $0x2] sm:$0x3]  ;;  %v208_v7 = vld [vmem:[%s664_s15 + $0x8] sm:$0x3]  ;;  %vm237_vm0 = vcmask 1041408   ;;  %v224_v8 = vmul.f32 3.0, %v207_v3 }
  0x25   : > { %v209_v9 = vld [vmem:[%s664_s15 + $0xa] sm:$0x3]  ;;  %v225_v10 = vmul.f32 4.0, %v208_v7  ;;  %v238_v11 = vsel %vm237_vm0, %v221_v4, 0.0  ;;  %v239_v12 = vsel %vm237_vm0, %v205_v6, 0.0  ;;  %v241_v13 = vsel %vm237_vm0, %v223_v5, 0.0 }
  0x26   : > { %v210_v14 = vld [vmem:[%s664_s15 + $0xc] sm:$0x3]  ;;  %v240_v15 = vadd.f32 %v239_v12, %v238_v11  ;;  %v226_v16 = vmul.f32 5.0, %v209_v9  ;;  %v243_v17 = vsel %vm237_vm0, %v224_v8, 0.0  ;;  %v211_v18 = vld [vmem:[%s664_s15 + $0xe] sm:$0x3] }
  0x27   : > { %v227_v20 = vmul.f32 6.0, %v210_v14  ;;  %v245_v21 = vsel %vm237_vm0, %v225_v10, 0.0  ;;  %v212_v22 = vld [vmem:[%s664_s15 + $0x10] sm:$0x3]  ;;  %v228_v24 = vmul.f32 7.0, %v211_v18  ;;  %s388_s16 = sshll.u32 %s660_s5, 1 }
  0x28   : > { %v242_v19 = vadd.f32 %v241_v13, %v240_v15  ;;  %v247_v25 = vsel %vm237_vm0, %v226_v16, 0.0  ;;  %v213_v26 = vld [vmem:[%s664_s15 + $0x12] sm:$0x3]  ;;  %v229_v28 = vmul.f32 8.0, %v212_v22  ;;  %v214_v30 = vld [vmem:[%s664_s15 + $0x14] sm:$0x3] }
  0x29   : > { %v249_v29 = vsel %vm237_vm0, %v227_v20, 0.0  ;;  %v230_v32 = vmul.f32 9.0, %v213_v26  ;;  %v251_v33 = vsel %vm237_vm0, %v228_v24, 0.0  ;;  %v215_v34 = vld [vmem:[%s664_s15 + $0x16] sm:$0x3]  ;;  %v231_v36 = vmul.f32 10.0, %v214_v30 }
  0x2a   : > { %v244_v23 = vadd.f32 %v243_v17, %v242_v19  ;;  %v253_v37 = vsel %vm237_vm0, %v229_v28, 0.0  ;;  %v216_v38 = vld [vmem:[%s664_s15 + $0x18] sm:$0x3]  ;;  %v232_v40 = vmul.f32 11.0, %v215_v34  ;;  %v217_v42 = vld [vmem:[%s664_s15 + $0x1a] sm:$0x3] }
  0x2b   : > { %v255_v41 = vsel %vm237_vm0, %v230_v32, 0.0  ;;  %v233_v44 = vmul.f32 12.0, %v216_v38  ;;  %v257_v45 = vsel %vm237_vm0, %v231_v36, 0.0  ;;  %v218_v46 = vld [vmem:[%s664_s15 + $0x1c] sm:$0x3]  ;;  %v234_v48 = vmul.f32 13.0, %v217_v42 }
  0x2c   : > { %v246_v27 = vadd.f32 %v245_v21, %v244_v23  ;;  %v259_v49 = vsel %vm237_vm0, %v232_v40, 0.0  ;;  %v219_v50 = vld [vmem:[%s664_s15 + $0x1e] sm:$0x3]  ;;  %v235_v52 = vmul.f32 14.0, %v218_v46  ;;  %s390_s17 = sshll.u32 %s563_s9, 1  ;;  %s164_s24 = scalar_lea.vmem [#allocation6], %s388_s16 }
  0x2d   : > { %v261_v53 = vsel %vm237_vm0, %v233_v44, 0.0  ;;  %v236_v55 = vmul.f32 15.0, %v219_v50  ;;  %v263_v56 = vsel %vm237_vm0, %v234_v48, 0.0  ;;  %v220_v62 = vld [vmem:[#allocation2] sm:$0x3]  ;;  %s288_s23 = scalar_lea.hbm %s742_s1, %s390_s17  ;;  %s290_s25 = sshll.u32 %s164_s24, 4  ;;  %s291_s25 = int_to_ptr.vmem [resolvable:$true] %s290_s25 }
  0x2e   : > { %v248_v31 = vadd.f32 %v247_v25, %v246_v27  ;;  %v265_v58 = vsel %vm237_vm0, %v235_v52, 0.0  ;;  %s292_s26 = sshll.u32 %s288_s23, 4  ;;  %s277_s27 = scalar_lea.sflag [#allocation5], %s660_s5  ;;  %s293_s26 = int_to_ptr.hbm [resolvable:$true] %s292_s26 }
  0x2f   : > { %v267_v60 = vsel %vm237_vm0, %v236_v55, 0.0  ;;  %s503_s28 = sshra.s32 %s293_s26, 4  ;;  %s509_s2 = scalar_lea.hbm %s742_s1, 4  ;;  %s504_s28 = int_to_ptr.hbm [resolvable:$true] %s503_s28 }
  0x30   : > { %v250_v35 = vadd.f32 %v249_v29, %v248_v31  ;;  %s505_s29 = scalar_lea.hbm %s504_s28, 2  ;;  %p510_p7 = scmp.lt.s32.totalorder %s504_s28, %s742_s1 }
  0x31   : > { %p506_p4 = scmp.ne.s32.totalorder %s504_s28, %s505_s29  ;;  %p511_p8 = scmp.lt.s32.totalorder %s509_s2, %s505_s29 }
  0x32   : > { %v252_v39 = vadd.f32 %v251_v33, %v250_v35 }
  0x33   : > { %p507_p5 = pnand %p506_p4, %p637_p9  ;;  %p512_p10 = por %p511_p8, %p510_p7 }
  0x34   : > { %v254_v43 = vadd.f32 %v253_v37, %v252_v39 }
  0x35   : > { %p508_p6 = pneg %p507_p5 }
  0x36   : > { %v256_v47 = vadd.f32 %v255_v41, %v254_v43 }
  0x37   : > { %p513_p13 = pnand %p512_p10, %p508_p6 }
  0x38   : > { %v258_v51 = vadd.f32 %v257_v45, %v256_v47 }
  0x3a   : > { %v260_v54 = vadd.f32 %v259_v49, %v258_v51 }
  0x3c   : > { %v262_v57 = vadd.f32 %v261_v53, %v260_v54 }
  0x3e   : > { %v264_v59 = vadd.f32 %v263_v56, %v262_v57 }
  0x40   : > { %v266_v61 = vadd.f32 %v265_v58, %v264_v59 }
  0x42   : > { %v268_v63 = vadd.f32 %v267_v60, %v266_v61 }
  0x44   : > { %v269_v0 = vadd.f32 %v268_v63, %v220_v62 }
  0x46   : > { %270 = vst [vmem:[#allocation2] sm:$0x3] %v269_v0 }
  0x4d   : > { %v274_v1 = vld [vmem:[#allocation2] sm:$0x3] }
  0x4e   : > { %275 = vst [vmem:[%s164_s24] sm:$0x3] %v274_v1 }
  0x4f   : > { %516 = shalt.err (!%p513_p13)
}
  0x50   : > { %396 = dma.vmem_to_hbm [thread:$0]  (%p637_p9), %s291_s25, 32, %s293_s26, %s277_s27  }
  0x51 PF: > { %s304_s5 = sand.u32 1, %s551_s6   ;;  %p403_p0 = pnand %p382_p12, %p644_p11 }
  0x52   : > { %s305_s12 = scalar_lea.sflag [#allocation5], %s304_s5 }
  0x53   : > { %p404_p1 = pneg %p403_p0 }
  0x55   : > { %546 = dma.done.wait (%p404_p1), %s305_s12, 32  }
  0x56   : > { %548 = vsyncadd (%p404_p1), %s305_s12, 4294967264  ;;  %s17_s11 = sadd.s32 1, %s571_s11   ;;  %s747_s6 = smov %s555_s7 }
  0x57   : > { %p14_p2 = scmp.ge.s32.totalorder %s17_s11, 4   ;;  %s748_s7 = smov %s559_s8 }
  0x58   : > { %s749_s8 = smov %s642_s20  ;;  %s750_s9 = smov %s567_s10 }
  0x59   : > { %s751_s10 = smov %s753_s14  ;;  %16 = sbr.rel (!%p14_p2) target bundleno = 6 (0x6), region = 77 }
  0x5e   :  { %311 = vsyncpa [#allocation4], 1 }
  0x5f   :  { %313 = vsyncpa [#allocation4 + $0x1], 1 }
  0x60   :  { %314 = vsyncpa [#allocation5], 1 }
  0x61   :  { %316 = vsyncpa [#allocation5 + $0x1], 1 }

</bundles_post_ra>
